<compile_context>
chip_gen: v7x
topology: tpu7x:2x2x1
jax: 0.10.0
libtpu: 0.0.40
codegen_flags: <defaults>
</compile_context>

<pallas_src>
import jax
import jax.numpy as jnp
from jax.experimental import pallas as pl
from jax.experimental.pallas import tpu as pltpu


def _round_up(x, m):
    return ((x + m - 1) // m) * m


# --------------------------------------------------------------------------- #
# Stage 1: input projection   gx = x_rows @ W_ih^T + (b_ih + b_hh)             #
# --------------------------------------------------------------------------- #
def proj_kernel(x_ref, w_ref, b_ref, o_ref):
    # x_ref: (tm, I), w_ref: (I, 4H), b_ref: (1, 4H), o_ref: (tm, 4H)
    o_ref[...] = (
        jnp.dot(x_ref[...], w_ref[...], preferred_element_type=jnp.float32)
        + b_ref[...]
    ).astype(o_ref.dtype)


# --------------------------------------------------------------------------- #
# Stage 2: sequential LSTM recurrence + fused final Linear                     #
# --------------------------------------------------------------------------- #
def lstm_scan_kernel(gx_ref, whh_ref, wfc_ref, bfc_ref, o_ref, h_ref, c_ref):
    # gx_ref : (1, B, 4H)  precomputed input projection for this timestep
    # whh_ref: (H, 4H)     recurrent weight (transposed), resident across grid
    # wfc_ref: (H, H)      fc weight (transposed), resident
    # bfc_ref: (1, H)      fc bias, resident
    # o_ref  : (B, H)      output = fc(h_T), written once at the last step
    # h_ref, c_ref: (B, H) f32 VMEM scratch carried across grid steps
    t = pl.program_id(0)
    h_dim = h_ref.shape[-1]

    @pl.when(t == 0)
    def _init():
        h_ref[...] = jnp.zeros_like(h_ref)
        c_ref[...] = jnp.zeros_like(c_ref)

    gates = gx_ref[0] + jnp.dot(
        h_ref[...], whh_ref[...], preferred_element_type=jnp.float32
    )
    # PyTorch gate order: input, forget, cell (g), output
    i_g = jax.nn.sigmoid(gates[:, 0 * h_dim:1 * h_dim])
    f_g = jax.nn.sigmoid(gates[:, 1 * h_dim:2 * h_dim])
    g_g = jnp.tanh(gates[:, 2 * h_dim:3 * h_dim])
    o_g = jax.nn.sigmoid(gates[:, 3 * h_dim:4 * h_dim])

    c_new = f_g * c_ref[...] + i_g * g_g
    h_new = o_g * jnp.tanh(c_new)
    c_ref[...] = c_new
    h_ref[...] = h_new

    @pl.when(t == pl.num_programs(0) - 1)
    def _final():
        out = (
            jnp.dot(h_new, wfc_ref[...], preferred_element_type=jnp.float32)
            + bfc_ref[...]
        )
        o_ref[...] = out.astype(o_ref.dtype)


def lstm_model_forward(x, params, *, tm=512):
    """x: (B, T, I) batch-first.  params: (w_ih, w_hh, b_ih, b_hh, w_fc, b_fc)
    in PyTorch layouts: w_ih (4H, I), w_hh (4H, H), w_fc (H, H)."""
    w_ih, w_hh, b_ih, b_hh, w_fc, b_fc = params
    B, T, I = x.shape
    H = w_hh.shape[1]
    G = 4 * H

    f32 = jnp.float32
    # Hoist transposes / casts out of the kernels (these blocks stay resident).
    wih_t = w_ih.T.astype(f32)                        # (I, 4H)
    whh_t = w_hh.T.astype(f32)                        # (H, 4H)
    b_gates = (b_ih + b_hh).reshape(1, G).astype(f32)
    wfc_t = w_fc.T.astype(f32)                        # (H, H)
    bfc2d = b_fc.reshape(1, H).astype(f32)

    # ---- Stage 1: one big lane-dense matmul over all timesteps ----
    xt = jnp.transpose(x, (1, 0, 2)).reshape(T * B, I).astype(f32)  # time-major rows
    M = T * B
    tm_eff = min(tm, _round_up(M, 8))                 # large tile, clamped to problem
    Mp = _round_up(M, tm_eff)                         # pad rows instead of asserting
    if Mp != M:
        xt = jnp.pad(xt, ((0, Mp - M), (0, 0)))

    gx = pl.pallas_call(
        proj_kernel,
        out_shape=jax.ShapeDtypeStruct((Mp, G), f32),
        grid_spec=pltpu.PrefetchScalarGridSpec(
            num_scalar_prefetch=0,
            grid=(Mp // tm_eff,),
            in_specs=[
                pl.BlockSpec((tm_eff, I), lambda i: (i, 0)),   # input rows
                pl.BlockSpec((I, G), lambda i: (0, 0)),        # W_ih^T (resident)
                pl.BlockSpec((1, G), lambda i: (0, 0)),        # combined bias
            ],
            out_specs=pl.BlockSpec((tm_eff, G), lambda i: (i, 0)),
        ),
        compiler_params=pltpu.CompilerParams(
            dimension_semantics=("parallel",)),
        cost_estimate=pl.CostEstimate(
            flops=2 * Mp * I * G,
            transcendentals=0,
            bytes_accessed=4 * (Mp * I + I * G + G + Mp * G)),
    )(xt, wih_t, b_gates)

    gx = gx[:M].reshape(T, B, G)                      # time-major gate pre-activations

    # ---- Stage 2: sequential recurrence over T, fc fused into the last step ----
    out = pl.pallas_call(
        lstm_scan_kernel,
        out_shape=jax.ShapeDtypeStruct((B, H), x.dtype),
        grid_spec=pltpu.PrefetchScalarGridSpec(
            num_scalar_prefetch=0,
            grid=(T,),
            in_specs=[
                pl.BlockSpec((1, B, G), lambda t: (t, 0, 0)),  # gx[t]
                pl.BlockSpec((H, G), lambda t: (0, 0)),        # W_hh^T (resident)
                pl.BlockSpec((H, H), lambda t: (0, 0)),        # W_fc^T (resident)
                pl.BlockSpec((1, H), lambda t: (0, 0)),        # b_fc (resident)
            ],
            out_specs=pl.BlockSpec((B, H), lambda t: (0, 0)),  # written at last step
            scratch_shapes=[
                pltpu.VMEM((B, H), jnp.float32),               # h carry
                pltpu.VMEM((B, H), jnp.float32),               # c carry
            ],
        ),
        compiler_params=pltpu.CompilerParams(
            dimension_semantics=("arbitrary",)),               # sequential over time
        cost_estimate=pl.CostEstimate(
            flops=T * 2 * B * H * G + 2 * B * H * H,
            transcendentals=T * B * 5 * H,
            bytes_accessed=4 * (T * B * G + H * G + H * H + H + B * H)),
    )(gx, whh_t, wfc_t, bfc2d)
    return out


def lstm_model_reference(x, params):
    """Pure-JAX reference matching the PyTorch LSTM_Model forward."""
    w_ih, w_hh, b_ih, b_hh, w_fc, b_fc = params
    B, T, I = x.shape
    H = w_hh.shape[1]

    def step(carry, x_t):
        h, c = carry
        gates = x_t @ w_ih.T + b_ih + h @ w_hh.T + b_hh
        i = jax.nn.sigmoid(gates[:, 0:H])
        f = jax.nn.sigmoid(gates[:, H:2 * H])
        g = jnp.tanh(gates[:, 2 * H:3 * H])
        o = jax.nn.sigmoid(gates[:, 3 * H:4 * H])
        c = f * c + i * g
        h = o * jnp.tanh(c)
        return (h, c), None

    h0 = jnp.zeros((B, H), jnp.float32)
    c0 = jnp.zeros((B, H), jnp.float32)
    (hT, _), _ = jax.lax.scan(step, (h0, c0), jnp.transpose(x, (1, 0, 2)))
    return hT @ w_fc.T + b_fc


if __name__ == "__main__":
    key = jax.random.PRNGKey(0)
    ks = jax.random.split(key, 7)

    # batch=2, seq=8, input_size=16, hidden=32  (4H = 128 -> lane-dense gates)
    B, T, I, H = 2, 8, 16, 32
    x = jax.random.normal(ks[0], (B, T, I), dtype=jnp.float32)

    bound = 1.0 / (H ** 0.5)          # PyTorch default uniform init for LSTM / Linear
    w_ih = jax.random.uniform(ks[1], (4 * H, I), jnp.float32, -bound, bound)
    w_hh = jax.random.uniform(ks[2], (4 * H, H), jnp.float32, -bound, bound)
    b_ih = jax.random.uniform(ks[3], (4 * H,), jnp.float32, -bound, bound)
    b_hh = jax.random.uniform(ks[4], (4 * H,), jnp.float32, -bound, bound)
    w_fc = jax.random.uniform(ks[5], (H, H), jnp.float32, -bound, bound)
    b_fc = jax.random.uniform(ks[6], (H,), jnp.float32, -bound, bound)
    params = (w_ih, w_hh, b_ih, b_hh, w_fc, b_fc)

    out = jax.jit(lstm_model_forward)(x, params)
    out = jax.block_until_ready(out)

    with jax.default_matmul_precision("highest"):
        ref = lstm_model_reference(x, params)

    assert out.shape == (B, H)
    assert jnp.allclose(out, ref, atol=5e-3, rtol=5e-3), (
        "mismatch vs reference, max abs err = "
        f"{float(jnp.max(jnp.abs(out - ref)))}")

    print("KERNEL_OK")
</pallas_src>

<mosaic_0001>
module attributes {stable_mosaic.version = 11 : i64} {
  func.func @proj_kernel(%arg0: i32, %arg1: memref<16x16xf32, #tpu.memory_space<vmem>>, %arg2: memref<16x128xf32, #tpu.memory_space<vmem>>, %arg3: memref<1x128xf32, #tpu.memory_space<vmem>>, %arg4: memref<16x128xf32, #tpu.memory_space<vmem>>) attributes {dimension_semantics = [#tpu.dimension_semantics<parallel>], iteration_bounds = array<i64: 1>, scalar_prefetch = 0 : i64, scratch_operands = 0 : i64, tpu.core_type = #tpu.core_type<tc>, window_params = [{transform_indices = @transform_0, window_bounds = array<i64: 16, 16>}, {pipeline_mode = #tpu.pipeline_mode<synchronous>, transform_indices = @transform_1, window_bounds = array<i64: 16, 128>}, {pipeline_mode = #tpu.pipeline_mode<synchronous>, transform_indices = @transform_2, window_bounds = array<i64: 1, 128>}, {transform_indices = @transform_3, window_bounds = array<i64: 16, 128>}]} {
    %c0 = arith.constant 0 : index
    %c0_0 = arith.constant 0 : index
    %0 = vector.load %arg1[%c0, %c0_0] : memref<16x16xf32, #tpu.memory_space<vmem>>, vector<16x16xf32>
    %c0_1 = arith.constant 0 : index
    %c0_2 = arith.constant 0 : index
    %1 = vector.load %arg2[%c0_1, %c0_2] : memref<16x128xf32, #tpu.memory_space<vmem>>, vector<16x128xf32>
    %cst = arith.constant dense<0.000000e+00> : vector<16x128xf32>
    %2 = tpu.matmul %0, %1, %cst {dimension_numbers = #tpu.dot_dimension_numbers<[1], [0], [0], [1], [0, 0, 1, 1], [], []>} : vector<16x16xf32>, vector<16x128xf32>, vector<16x128xf32> -> vector<16x128xf32>
    %c0_3 = arith.constant 0 : index
    %c0_4 = arith.constant 0 : index
    %3 = vector.load %arg3[%c0_3, %c0_4] : memref<1x128xf32, #tpu.memory_space<vmem>>, vector<1x128xf32>
    %4 = vector.broadcast %3 : vector<1x128xf32> to vector<16x128xf32>
    %5 = arith.addf %2, %4 : vector<16x128xf32>
    %c0_5 = arith.constant 0 : index
    %c0_6 = arith.constant 0 : index
    %6 = vector.load %arg4[%c0_5, %c0_6] : memref<16x128xf32, #tpu.memory_space<vmem>>, vector<16x128xf32>
    tpu.vector_store %arg4[%c0_5, %c0_6], %5 {strides = array<i32>} : memref<16x128xf32, #tpu.memory_space<vmem>>, vector<16x128xf32>,
    return
  }
  func.func @transform_0(%arg0: i32) -> (i32, i32) {
    %c0_i32 = arith.constant 0 : i32
    %c0_i32_0 = arith.constant 0 : i32
    return %arg0, %c0_i32 : i32, i32
  }
  func.func @transform_1(%arg0: i32) -> (i32, i32) {
    %c0_i32 = arith.constant 0 : i32
    %c0_i32_0 = arith.constant 0 : i32
    %c0_i32_1 = arith.constant 0 : i32
    return %c0_i32, %c0_i32_0 : i32, i32
  }
  func.func @transform_2(%arg0: i32) -> (i32, i32) {
    %c0_i32 = arith.constant 0 : i32
    %c0_i32_0 = arith.constant 0 : i32
    %c0_i32_1 = arith.constant 0 : i32
    return %c0_i32, %c0_i32_0 : i32, i32
  }
  func.func @transform_3(%arg0: i32) -> (i32, i32) {
    %c0_i32 = arith.constant 0 : i32
    %c0_i32_0 = arith.constant 0 : i32
    return %arg0, %c0_i32 : i32, i32
  }
}

module attributes {stable_mosaic.version = 11 : i64} {
  func.func @lstm_scan_kernel(%arg0: i32, %arg1: memref<1x2x128xf32, #tpu.memory_space<vmem>>, %arg2: memref<32x128xf32, #tpu.memory_space<vmem>>, %arg3: memref<32x32xf32, #tpu.memory_space<vmem>>, %arg4: memref<1x32xf32, #tpu.memory_space<vmem>>, %arg5: memref<2x32xf32, #tpu.memory_space<vmem>>, %arg6: memref<2x32xf32, #tpu.memory_space<vmem>>, %arg7: memref<2x32xf32, #tpu.memory_space<vmem>>) attributes {dimension_semantics = [#tpu.dimension_semantics<arbitrary>], iteration_bounds = array<i64: 8>, scalar_prefetch = 0 : i64, scratch_operands = 2 : i64, tpu.core_type = #tpu.core_type<tc>, window_params = [{transform_indices = @transform_0, window_bounds = array<i64: 1, 2, 128>}, {pipeline_mode = #tpu.pipeline_mode<synchronous>, transform_indices = @transform_1, window_bounds = array<i64: 32, 128>}, {pipeline_mode = #tpu.pipeline_mode<synchronous>, transform_indices = @transform_2, window_bounds = array<i64: 32, 32>}, {pipeline_mode = #tpu.pipeline_mode<synchronous>, transform_indices = @transform_3, window_bounds = array<i64: 1, 32>}, {pipeline_mode = #tpu.pipeline_mode<synchronous>, transform_indices = @transform_4, window_bounds = array<i64: 2, 32>}]} {
    %c0_i32 = arith.constant 0 : i32
    %0 = arith.cmpi eq, %arg0, %c0_i32 : i32
    %1 = arith.extui %0 : i1 to i32
    %c0_i32_0 = arith.constant 0 : i32
    %2 = arith.cmpi ne, %1, %c0_i32_0 : i32
    scf.if %2 {
      %cst_17 = arith.constant 0.000000e+00 : f32
      %40 = vector.broadcast %cst_17 : f32 to vector<2x32xf32>
      %c0_18 = arith.constant 0 : index
      %c0_19 = arith.constant 0 : index
      %41 = vector.load %arg6[%c0_18, %c0_19] : memref<2x32xf32, #tpu.memory_space<vmem>>, vector<2x32xf32>
      tpu.vector_store %arg6[%c0_18, %c0_19], %40 {strides = array<i32>} : memref<2x32xf32, #tpu.memory_space<vmem>>, vector<2x32xf32>,
      %cst_20 = arith.constant 0.000000e+00 : f32
      %42 = vector.broadcast %cst_20 : f32 to vector<2x32xf32>
      %c0_21 = arith.constant 0 : index
      %c0_22 = arith.constant 0 : index
      %43 = vector.load %arg7[%c0_21, %c0_22] : memref<2x32xf32, #tpu.memory_space<vmem>>, vector<2x32xf32>
      tpu.vector_store %arg7[%c0_21, %c0_22], %42 {strides = array<i32>} : memref<2x32xf32, #tpu.memory_space<vmem>>, vector<2x32xf32>,
    } else {
    }
    %c0 = arith.constant 0 : index
    %c0_1 = arith.constant 0 : index
    %c0_2 = arith.constant 0 : index
    %3 = vector.load %arg1[%c0, %c0_1, %c0_2] : memref<1x2x128xf32, #tpu.memory_space<vmem>>, vector<1x2x128xf32>
    %4 = vector.shape_cast %3 : vector<1x2x128xf32> to vector<2x128xf32>
    %c0_3 = arith.constant 0 : index
    %c0_4 = arith.constant 0 : index
    %5 = vector.load %arg6[%c0_3, %c0_4] : memref<2x32xf32, #tpu.memory_space<vmem>>, vector<2x32xf32>
    %c0_5 = arith.constant 0 : index
    %c0_6 = arith.constant 0 : index
    %6 = vector.load %arg2[%c0_5, %c0_6] : memref<32x128xf32, #tpu.memory_space<vmem>>, vector<32x128xf32>
    %cst = arith.constant dense<0.000000e+00> : vector<2x128xf32>
    %7 = tpu.matmul %5, %6, %cst {dimension_numbers = #tpu.dot_dimension_numbers<[1], [0], [0], [1], [0, 0, 1, 1], [], []>} : vector<2x32xf32>, vector<32x128xf32>, vector<2x128xf32> -> vector<2x128xf32>
    %8 = arith.addf %4, %7 : vector<2x128xf32>
    %9 = vector.extract_strided_slice %8 {offsets = [0, 0], sizes = [2, 32], strides = [1, 1]} : vector<2x128xf32> to vector<2x32xf32>
    %10 = arith.negf %9 : vector<2x32xf32>
    %11 = math.exp %10 : vector<2x32xf32>
    %cst_7 = arith.constant 1.000000e+00 : f32
    %12 = vector.broadcast %cst_7 : f32 to vector<2x32xf32>
    %13 = arith.addf %12, %11 : vector<2x32xf32>
    %14 = arith.divf %12, %13 : vector<2x32xf32>
    %15 = vector.extract_strided_slice %8 {offsets = [0, 32], sizes = [2, 32], strides = [1, 1]} : vector<2x128xf32> to vector<2x32xf32>
    %16 = arith.negf %15 : vector<2x32xf32>
    %17 = math.exp %16 : vector<2x32xf32>
    %cst_8 = arith.constant 1.000000e+00 : f32
    %18 = vector.broadcast %cst_8 : f32 to vector<2x32xf32>
    %19 = arith.addf %18, %17 : vector<2x32xf32>
    %20 = arith.divf %18, %19 : vector<2x32xf32>
    %21 = vector.extract_strided_slice %8 {offsets = [0, 64], sizes = [2, 32], strides = [1, 1]} : vector<2x128xf32> to vector<2x32xf32>
    %22 = math.tanh %21 : vector<2x32xf32>
    %23 = vector.extract_strided_slice %8 {offsets = [0, 96], sizes = [2, 32], strides = [1, 1]} : vector<2x128xf32> to vector<2x32xf32>
    %24 = arith.negf %23 : vector<2x32xf32>
    %25 = math.exp %24 : vector<2x32xf32>
    %cst_9 = arith.constant 1.000000e+00 : f32
    %26 = vector.broadcast %cst_9 : f32 to vector<2x32xf32>
    %27 = arith.addf %26, %25 : vector<2x32xf32>
    %28 = arith.divf %26, %27 : vector<2x32xf32>
    %c0_10 = arith.constant 0 : index
    %c0_11 = arith.constant 0 : index
    %29 = vector.load %arg7[%c0_10, %c0_11] : memref<2x32xf32, #tpu.memory_space<vmem>>, vector<2x32xf32>
    %30 = arith.mulf %20, %29 : vector<2x32xf32>
    %31 = arith.mulf %14, %22 : vector<2x32xf32>
    %32 = arith.addf %30, %31 : vector<2x32xf32>
    %33 = math.tanh %32 : vector<2x32xf32>
    %34 = arith.mulf %28, %33 : vector<2x32xf32>
    %c0_12 = arith.constant 0 : index
    %c0_13 = arith.constant 0 : index
    %35 = vector.load %arg7[%c0_12, %c0_13] : memref<2x32xf32, #tpu.memory_space<vmem>>, vector<2x32xf32>
    tpu.vector_store %arg7[%c0_12, %c0_13], %32 {strides = array<i32>} : memref<2x32xf32, #tpu.memory_space<vmem>>, vector<2x32xf32>,
    %c0_14 = arith.constant 0 : index
    %c0_15 = arith.constant 0 : index
    %36 = vector.load %arg6[%c0_14, %c0_15] : memref<2x32xf32, #tpu.memory_space<vmem>>, vector<2x32xf32>
    tpu.vector_store %arg6[%c0_14, %c0_15], %34 {strides = array<i32>} : memref<2x32xf32, #tpu.memory_space<vmem>>, vector<2x32xf32>,
    %c7_i32 = arith.constant 7 : i32
    %37 = arith.cmpi eq, %arg0, %c7_i32 : i32
    %38 = arith.extui %37 : i1 to i32
    %c0_i32_16 = arith.constant 0 : i32
    %39 = arith.cmpi ne, %38, %c0_i32_16 : i32
    scf.if %39 {
      %c0_17 = arith.constant 0 : index
      %c0_18 = arith.constant 0 : index
      %40 = vector.load %arg3[%c0_17, %c0_18] : memref<32x32xf32, #tpu.memory_space<vmem>>, vector<32x32xf32>
      %cst_19 = arith.constant dense<0.000000e+00> : vector<2x32xf32>
      %41 = tpu.matmul %34, %40, %cst_19 {dimension_numbers = #tpu.dot_dimension_numbers<[1], [0], [0], [1], [0, 0, 1, 1], [], []>} : vector<2x32xf32>, vector<32x32xf32>, vector<2x32xf32> -> vector<2x32xf32>
      %c0_20 = arith.constant 0 : index
      %c0_21 = arith.constant 0 : index
      %42 = vector.load %arg4[%c0_20, %c0_21] : memref<1x32xf32, #tpu.memory_space<vmem>>, vector<1x32xf32>
      %43 = vector.broadcast %42 : vector<1x32xf32> to vector<2x32xf32>
      %44 = arith.addf %41, %43 : vector<2x32xf32>
      %c0_22 = arith.constant 0 : index
      %c0_23 = arith.constant 0 : index
      %45 = vector.load %arg5[%c0_22, %c0_23] : memref<2x32xf32, #tpu.memory_space<vmem>>, vector<2x32xf32>
      tpu.vector_store %arg5[%c0_22, %c0_23], %44 {strides = array<i32>} : memref<2x32xf32, #tpu.memory_space<vmem>>, vector<2x32xf32>,
    } else {
    }
    return
  }
  func.func @transform_0(%arg0: i32) -> (i32, i32, i32) {
    %c0_i32 = arith.constant 0 : i32
    %c0_i32_0 = arith.constant 0 : i32
    %c0_i32_1 = arith.constant 0 : i32
    return %arg0, %c0_i32, %c0_i32_0 : i32, i32, i32
  }
  func.func @transform_1(%arg0: i32) -> (i32, i32) {
    %c0_i32 = arith.constant 0 : i32
    %c0_i32_0 = arith.constant 0 : i32
    %c0_i32_1 = arith.constant 0 : i32
    return %c0_i32, %c0_i32_0 : i32, i32
  }
  func.func @transform_2(%arg0: i32) -> (i32, i32) {
    %c0_i32 = arith.constant 0 : i32
    %c0_i32_0 = arith.constant 0 : i32
    %c0_i32_1 = arith.constant 0 : i32
    return %c0_i32, %c0_i32_0 : i32, i32
  }
  func.func @transform_3(%arg0: i32) -> (i32, i32) {
    %c0_i32 = arith.constant 0 : i32
    %c0_i32_0 = arith.constant 0 : i32
    %c0_i32_1 = arith.constant 0 : i32
    return %c0_i32, %c0_i32_0 : i32, i32
  }
  func.func @transform_4(%arg0: i32) -> (i32, i32) {
    %c0_i32 = arith.constant 0 : i32
    %c0_i32_0 = arith.constant 0 : i32
    %c0_i32_1 = arith.constant 0 : i32
    return %c0_i32, %c0_i32_0 : i32, i32
  }
}

</mosaic_0001>

<bundles_post_ra>
// kernel: lstm_model_forward.2
= control target key start
LH: loop header
LB: loop body
LE: loop exit
PB: predicated region body
PF: predicated region fallthrough
CT: control target
= control target key end

     0   :  { %vm25_vm0 = vcmask 130048   ;;  %s172_s1 = inlined_call_operand.vmem [shape: f32[16,128], index: 1, kind: input, shape index: {}]   ;;  %s173_s0 = inlined_call_operand.vmem [shape: f32[16,16], index: 0, kind: input, shape index: {}]   ;;  %s174_s2 = inlined_call_operand.vmem [shape: f32[1,128], index: 2, kind: input, shape index: {}]   ;;  %s175_s3 = inlined_call_operand.vmem [shape: f32[16,128], index: 3, kind: output, shape index: {}]  }
   0x1   :  { %v16_v0 = vld [vmem:[%s172_s1] sm:$0xff]  ;;  %v17_v1 = vld [vmem:[%s172_s1 + $0x8] sm:$0xff] }
   0x2   :  { %v14_v2 = vld [vmem:[%s173_s0] sm:$0xff]  ;;  %v127_v3 = vpack.c.bf16 %v17_v1, %v16_v0  ;;  %v15_v4 = vld [vmem:[%s173_s0 + $0x8] sm:$0xff] }
   0x3   :  { %124 = vmatprep.mubr.msk.f32.mxu0 %vm25_vm0, %v14_v2  ;;  %v113_v5 = vld [vmem:[%s174_s2] ss:$0 sm:$0xff] }
   0x4   :  { %128 = vmatprep.subr.bf16.mxu0 %v127_v3 }
   0x5   :  { %130 = vmatpush3.bf16.msra.mxu0 %v127_v3 }
   0x8   :  { %125 = vmatmul.mubr.msk.f32.vlgmr.msra.gmra.mrb[0].mxu0 %vm25_vm0, %v15_v4 }
  0xdb   :  { %v126_v6 = vpop.f32.mrb[0].mxu0 }
  0xdc   :  { %v104_v7 = vadd.f32 %v126_v6, %v113_v5  ;;  %v98_v8 = vpop.f32.mrb[1].mxu0 }
  0xdd   :  { %v99_v9 = vadd.f32 %v113_v5, %v98_v8 }
  0xde   :  { %108 = vst [vmem:[%s175_s3 + $0x8] sm:$0xff] %v104_v7 }
  0xdf   :  { %107 = vst [vmem:[%s175_s3] sm:$0xff] %v99_v9 }

// kernel: lstm_model_forward.3
= control target key start
LH: loop header
LB: loop body
LE: loop exit
PB: predicated region body
PF: predicated region fallthrough
CT: control target
= control target key end

     0   :  { %9 = vsyncpa [#allocation5], 0  ;;  %s609_s15 = smov 0   ;;  %s684_s0 = inlined_call_operand.vmem [shape: f32[8,2,128], index: 0, kind: input, shape index: {}]   ;;  %s685_s1 = inlined_call_operand.vmem [shape: f32[32,128], index: 1, kind: input, shape index: {}]   ;;  %s686_s2 = inlined_call_operand.vmem [shape: f32[32,32], index: 2, kind: input, shape index: {}]   ;;  %s687_s3 = inlined_call_operand.vmem [shape: f32[1,32], index: 3, kind: input, shape index: {}]   ;;  %s688_s4 = inlined_call_operand.hbm [shape: f32[2,32], index: 4, kind: output, shape index: {}]  }
   0x1 LB: > { %s615_s16 = sadd.s32 4294967295, %s571_s15   ;;  %p446_p0 = scmp.ge.s32.totalorder %s571_s15, 1  ;;  %s571_s15 = sphi %s609_s15, %s15_s15  }
   0x2   : > { %p157_p1 = scmp.lt.s32.totalorder %s571_s15, 9 }
   0x4   : > { %p158_p2 = pnand %p446_p0, %p157_p1 }
   0x5   : > { %p177_p3 = scmp.lt.s32.totalorder (!%p158_p2), %s615_s16, 7  ;;  %p448_p4 = scmp.ne.s32.totalorder (!%p158_p2), %s615_s16, 0 }
   0x6   : > { %161 = sbr.rel (%p158_p2) target bundleno = 973 (0x3cd), region = 36 }
   0xd   : > { %s178_s17 = scalar_select %p177_p3, %s615_s16, 7 }
   0xe   : > { %184 = sbr.rel (%p448_p4) target bundleno = 21 (0x15), region = 40  ;;  %vm185_vm0 = vcmask (!%p448_p4), 254976   ;;  %v573_v0 = vmov (!%p448_p4), 0.0  }
   0xf   : > { %s447_s18 = sshll.u32 %s178_s17, 1  ;;  %186 = vst.msk [vmem:[#allocation2] sm:$0x3] (!%p448_p4), %vm185_vm0, %v573_v0  ;;  %187 = vst.msk [vmem:[#allocation3] sm:$0x3] (!%p448_p4), %vm185_vm0, %v573_v0 }
  0x10   : > { %s180_s21 = scalar_lea.vmem %s684_s0, %s447_s18 }
  0x15 PF: > { %v190_v1 = vld [vmem:[%s685_s1] sm:$0xff]  ;;  %v191_v2 = vld [vmem:[%s685_s1 + $0x8] sm:$0xff]  ;;  %v192_v3 = vld [vmem:[%s685_s1 + $0x10] sm:$0xff]  ;;  %v574_v4 = vmov 0.0|0.0   ;;  %vm575_vm1 = vmmov 0   ;;  %v576_v7 = vmov 0.0  }
  0x16   : > { %490 = vmatprep.subr.bf16.mxu0 %v574_v4  ;;  %v491_v5 = vpack.c.bf16 %v191_v2, %v190_v1  ;;  %v193_v6 = vld [vmem:[%s685_s1 + $0x18] sm:$0xff]  ;;  %476 = vmatprep.mubr.msk.f32.mxu0 %vm575_vm1, %v576_v7  ;;  %v189_v9 = vld [vmem:[#allocation2] sm:$0x3]  ;;  %vm194_vm2 = vcmask 261120   ;;  %s577_s30 = smov 64   ;;  %s578_s5 = smov 32  }
  0x17   : > { %v494_v8 = vpack.c.bf16 %v193_v6, %v192_v3  ;;  %v188_v10 = vld [vmem:[%s180_s21] sm:$0x3]  ;;  %v276_v15 = vld [vmem:[#allocation3] sm:$0x3]  ;;  %s579_s6 = smov 96   ;;  %vm302_vm3 = vcmask 254976  }
  0x18   : > { %492 = vmatpush3.bf16.msra.mxu0 %v491_v5  ;;  %p451_p5 = scmp.ne.s32.totalorder %s615_s16, 7 }
  0x19   : > { %493 = vmatprep.subr.bf16.mxu0 %v574_v4  ;;  %v313_v31 = vld [vmem:[%s686_s2] sm:$0xff] (!%p451_p5)  ;;  %v314_v32 = vld [vmem:[%s686_s2 + $0x8] sm:$0xff] (!%p451_p5)  ;;  %v315_v33 = vld [vmem:[%s686_s2 + $0x10] sm:$0xff] (!%p451_p5)  ;;  %v580_v34 = vmov (!%p451_p5), 0.0|0.0   ;;  %vm581_vm4 = vmmov (!%p451_p5), 0   ;;  %v582_v37 = vmov (!%p451_p5), 0.0  }
  0x1a   : > { %v497_v35 = vpack.c.bf16 (!%p451_p5), %v314_v32, %v313_v31  ;;  %v316_v36 = vld [vmem:[%s686_s2 + $0x18] sm:$0xff] (!%p451_p5)  ;;  %v452_v39 = vld [vmem:[%s687_s3] ss:$0 sm:$0xff] (!%p451_p5) }
  0x1b   : > { %v500_v38 = vpack.c.bf16 (!%p451_p5), %v316_v36, %v315_v33 }
  0x1c   : > { %495 = vmatpush3.bf16.msra.mxu0 %v494_v8 }
  0x1d   : > { %496 = vmatprep.subr.bf16.mxu0 (!%p451_p5), %v580_v34 }
  0x1f   : > { %477 = vmatmul.mubr.msk.f32.vlgmr.msra.gmra.mrb[0].mxu0 %vm194_vm2, %v189_v9 }
  0x20   : > { %487 = vmatprep.mubr.msk.f32.mxu0 (!%p451_p5), %vm581_vm4, %v582_v37  ;;  %498 = vmatpush3.bf16.msra.mxu0 (!%p451_p5), %v497_v35 }
  0x21   : > { %499 = vmatprep.subr.bf16.mxu0 (!%p451_p5), %v580_v34 }
  0x24   : > { %501 = vmatpush3.bf16.msra.mxu0 (!%p451_p5), %v500_v38 }
  0xf2   : > { %v264_v11 = vpop.f32.mrb[0].mxu0 }
  0xf3   : > { %v268_v12 = vadd.f32 %v264_v11, %v188_v10  ;;  %v478_v13 = vpop.f32.mrb[1].mxu0 }
  0xf5   : > { %527 = vtanh.f32 %v268_v12  ;;  %v450_v16 = vmul.f32 -1.442695, %v268_v12 }
  0xf7   : > { %529 = vpow2.f32 %v450_v16 }
  0xff   : > { %v528_v14 = vpop.eup %527 }
 0x100   : > { %283 = vrot.lane.b32.xlu0 %v528_v14, %s577_s30 }
 0x101   : > { %v530_v17 = vpop.eup %529 }
 0x102   : > { %v272_v18 = vadd.f32 1.0, %v530_v17 }
 0x104   : > { %278 = vrot.lane.b32.xlu0 %v276_v15, %s578_s5  ;;  %531 = vrcp.f32 %v272_v18 }
 0x10e   : > { %v532_v19 = vpop.eup %531 }
 0x172   : > { %v284_v20 = vpop.permute.xlu0 %283 }
 0x173   : > { %v286_v21 = vmul.f32 %v532_v19, %v284_v20 }
 0x175   : > { %288 = vrot.lane.b32.xlu1 %v286_v21, %s578_s5 }
 0x176   : > { %v279_v22 = vpop.permute.xlu0 %278 }
 0x177   : > { %v281_v23 = vmul.f32 %v532_v19, %v279_v22 }
 0x1e7   : > { %v289_v24 = vpop.permute.xlu1 %288 }
 0x1e8   : > { %v291_v25 = vadd.f32 %v289_v24, %v281_v23 }
 0x1ea   : > { %533 = vtanh.f32 %v291_v25  ;;  %299 = vrot.lane.b32.xlu0 %v291_v25, %s579_s6 }
 0x1f4   : > { %v534_v26 = vpop.eup %533 }
 0x1f5   : > { %294 = vrot.lane.b32.xlu1 %v534_v26, %s577_s30 }
 0x25c   : > { %v300_v27 = vpop.permute.xlu0 %299 }
 0x25d   : > { %303 = vst.msk [vmem:[#allocation3] sm:$0x3] %vm302_vm3, %v300_v27 }
 0x267   : > { %v295_v28 = vpop.permute.xlu1 %294 }
 0x268   : > { %v297_v29 = vmul.f32 %v532_v19, %v295_v28 }
 0x26a   : > { %305 = vrot.lane.b32.xlu1 %v297_v29, %s578_s5 }
 0x2d7   : > { %312 = sbr.rel (%p451_p5) target bundleno = 948 (0x3b4), region = 44 }
 0x2dc   : > { %v306_v30 = vpop.permute.xlu1 %305 }
 0x2dd   : > { %308 = vst.msk [vmem:[#allocation2] sm:$0x3] %vm302_vm3, %v306_v30  ;;  %488 = vmatmul.mubr.msk.f32.vlgmr.msra.gmra.mrb[0].mxu0 (!%p451_p5), %vm194_vm2, %v306_v30 }
 0x3b0   : > { %v392_v40 = vpop.f32.mrb[0].mxu0 }
 0x3b1   : > { %v393_v41 = vadd.f32 %v452_v39, %v392_v40  ;;  %v489_v42 = vpop.f32.mrb[1].mxu0 }
 0x3b3   : > { %396 = vst.msk [vmem:[#allocation4] sm:$0x3] %vm302_vm3, %v393_v41 }
 0x3b4 PF: > { %p506_p6 = scmp.eq.s32.totalorder %s615_s16, 7  ;;  %s583_s19 = smov [#allocation4]  }
 0x3b5   : > { %s404_s20 = sshll.u32 %s583_s19, 4  ;;  %s405_s20 = int_to_ptr.vmem [resolvable:$true] %s404_s20 }
 0x3b6   : > { %s535_s21 = scalar_lea.vmem %s405_s20, 32  ;;  %p542_p10 = scmp.lt.s32.totalorder %s405_s20, %s405_s20 }
 0x3b7   : > { %p536_p7 = scmp.ne.s32.totalorder %s405_s20, %s535_s21  ;;  %p543_p11 = scmp.lt.s32.totalorder %s535_s21, %s535_s21 }
 0x3b9   : > { %p537_p8 = pnand %p536_p7, %p506_p6  ;;  %p544_p12 = por %p543_p11, %p542_p10 }
 0x3bb   : > { %p538_p9 = pneg %p537_p8 }
 0x3bd   : > { %p545_p13 = pnand %p544_p12, %p538_p9 }
 0x3bf   : > { %548 = shalt.err (!%p545_p13)
}
 0x3c0   : > { %s549_s24 = scalar_lea.hbm %s688_s4, 32 }
 0x3c1   : > { %p550_p0 = scmp.ne.s32.totalorder %s688_s4, %s549_s24  ;;  %p555_p3 = scmp.lt.u32.totalorder %s549_s24, %s688_s4 }
 0x3c3   : > { %p551_p1 = pnand %p550_p0, %p506_p6 }
 0x3c5   : > { %p552_p2 = pneg %p551_p1 }
 0x3c7   : > { %p557_p4 = pnand %p555_p3, %p552_p2 }
 0x3c9   : > { %560 = shalt.err (!%p557_p4)
}
 0x3ca   : > { %503 = dma.vmem_to_hbm [thread:$0]  (%p506_p6), %s405_s20, 32, %s688_s4, [#allocation5]  }
 0x3cb   : > { %566 = dma.done.wait (%p506_p6), [#allocation5], 32  }
 0x3cc   : > { %568 = vsyncadd (%p506_p6), [#allocation5], 4294967264 }
 0x3cd PF: > { %s15_s15 = sadd.s32 1, %s571_s15  }
 0x3ce   : > { %p12_p5 = scmp.ge.s32.totalorder %s15_s15, 10  }
 0x3d0   :  { %14 = sbr.rel (!%p12_p5) target bundleno = 1 (0x1), region = 71 }
 0x3d7   :  { %417 = vsyncpa [#allocation5], 1 }
 0x3d8   :  { %419 = vsyncpa [#allocation5 + $0x1], 1 }

</bundles_post_ra>
